<compile_context>
chip_gen: v7x
topology: tpu7x:2x2x1
jax: 0.10.0
libtpu: 0.0.40
codegen_flags: <defaults>
</compile_context>

<pallas_src>
import functools

import jax
import jax.numpy as jnp
from jax import lax
from jax.experimental import pallas as pl
from jax.experimental.pallas import tpu as pltpu


def _attention_block_kernel(g_ref, x_ref, wg_ref, wx_ref, tgx_ref, wp_ref,
                            tp_ref, o_ref, *, psi_on_vpu):
    """One (batch, HW-tile) per grid step; NCHW-native (C, T_hw) layout.

    g_ref  : (F_g, T_hw)   gating features tile
    x_ref  : (F_l, T_hw)   skip-connection features tile
    wg_ref : (F_int, F_g)  BN-folded W_g 1x1 conv weight
    wx_ref : (F_int, F_l)  BN-folded W_x 1x1 conv weight
    tgx_ref: (F_int, 1)    pre-summed BN shifts of both branches (incl. biases)
    wp_ref : (F_int, 1)    BN-folded psi 1x1 conv weight (column form)
    tp_ref : (1,)  SMEM    BN-folded psi shift (scalar)
    o_ref  : (F_l, T_hw)   output tile = x * psi
    """
    g_mat = g_ref[...]
    x_mat = x_ref[...]

    # 1x1 convs == channel-contraction matmuls; the HW tile stays on the lane
    # axis so every intermediate and the output store is lane-dense.
    g1 = jnp.dot(wg_ref[...], g_mat, preferred_element_type=jnp.float32)
    x1 = jnp.dot(wx_ref[...], x_mat, preferred_element_type=jnp.float32)
    a = jnp.maximum(g1 + x1 + tgx_ref[...], 0.0)                    # ReLU

    if psi_on_vpu:
        # Small F_int: broadcast-mul (VPU) + sublane reduce (XLU) beats an
        # M=1 MXU matmul and frees the vex slot.
        psi_pre = jnp.sum(wp_ref[...] * a, axis=0, keepdims=True)
    else:
        # (F_int,1)^T @ (F_int,T_hw) -> (1,T_hw) on the MXU.
        psi_pre = lax.dot_general(wp_ref[...], a,
                                  (((0,), (0,)), ((), ())),
                                  preferred_element_type=jnp.float32)
    psi_pre = psi_pre + tp_ref[0]

    # Sigmoid: exp on the EUP, reciprocal on the EUP (approx) -> VALU stays free.
    psi = pl.reciprocal(1.0 + jnp.exp(-psi_pre), approx=True)

    # Broadcast the (1, T_hw) attention map over the F_l channel rows.
    o_ref[...] = (x_mat * psi).astype(o_ref.dtype)


def _round_up(v, m):
    return ((v + m - 1) // m) * m


def _pick_hw_tile(HW, bytes_per_lane, budget_bytes):
    """Largest 128-multiple lane tile whose double-buffered blocks fit budget."""
    if HW <= 128:
        return HW                      # block == full dim is always legal
    max_lanes = max(128, (budget_bytes // max(bytes_per_lane, 1)) // 128 * 128)
    return min(max_lanes, 8192, _round_up(HW, 128))


def attention_block_pallas(g_nchw, x_nchw, params, *,
                           vmem_block_budget_bytes=24 * 1024 * 1024):
    """g_nchw: (N, F_g, H, W), x_nchw: (N, F_l, H, W).  Returns (N, F_l, H, W)."""
    (wg, bg, gg, beg, mg, vg,
     wx, bx, gx, bex, mx, vx,
     wp, bp, gp, bep, mp, vp) = params
    eps = 1e-5

    N, F_g, H, W = g_nchw.shape
    _, F_l, _, _ = x_nchw.shape
    F_int = wg.shape[0]
    HW = H * W
    out_dtype = x_nchw.dtype

    # Fold BN (inference form) + conv bias into per-output-channel scale/shift;
    # the scale is pre-multiplied into the (tiny) weight matrices.
    sg = gg / jnp.sqrt(vg + eps)
    wg2 = (wg.reshape(F_int, F_g) * sg[:, None]).astype(jnp.float32)
    tg = beg + (bg - mg) * sg

    sx = gx / jnp.sqrt(vx + eps)
    wx2 = (wx.reshape(F_int, F_l) * sx[:, None]).astype(jnp.float32)
    tx = bex + (bx - mx) * sx

    # Pre-summed shift of the two branches: applied once after the two dots.
    tgx = (tg + tx).reshape(F_int, 1).astype(jnp.float32)

    sp = gp / jnp.sqrt(vp + eps)
    wp2 = (wp.reshape(1, F_int) * sp[:, None]).reshape(F_int, 1).astype(jnp.float32)
    tp = (bep + (bp - mp) * sp).reshape(1,).astype(jnp.float32)     # scalar -> SMEM

    # NCHW kept as-is: (N, C, H, W) -> (N, C, H*W) is a free reshape (no copy).
    g_flat = g_nchw.reshape(N, F_g, HW)
    x_flat = x_nchw.reshape(N, F_l, HW)

    # Lane-axis tile: double-buffered g + x + out streams must fit the budget.
    bytes_per_lane = 2 * (F_g * jnp.dtype(g_nchw.dtype).itemsize
                          + F_l * jnp.dtype(x_nchw.dtype).itemsize
                          + F_l * jnp.dtype(out_dtype).itemsize)
    T_hw = _pick_hw_tile(HW, bytes_per_lane, vmem_block_budget_bytes)
    n_hw = pl.cdiv(HW, T_hw)

    kernel = functools.partial(_attention_block_kernel,
                               psi_on_vpu=(F_int <= 32))

    out_flat = pl.pallas_call(
        kernel,
        out_shape=jax.ShapeDtypeStruct((N, F_l, HW), out_dtype),
        grid_spec=pltpu.PrefetchScalarGridSpec(
            num_scalar_prefetch=0,
            grid=(N, n_hw),
            in_specs=[
                pl.BlockSpec((pl.Squeezed(), F_g, T_hw), lambda b, t: (b, 0, t)),
                pl.BlockSpec((pl.Squeezed(), F_l, T_hw), lambda b, t: (b, 0, t)),
                pl.BlockSpec((F_int, F_g), lambda b, t: (0, 0)),
                pl.BlockSpec((F_int, F_l), lambda b, t: (0, 0)),
                pl.BlockSpec((F_int, 1), lambda b, t: (0, 0)),
                pl.BlockSpec((F_int, 1), lambda b, t: (0, 0)),
                pl.BlockSpec(memory_space=pltpu.MemorySpace.SMEM),
            ],
            out_specs=pl.BlockSpec((pl.Squeezed(), F_l, T_hw),
                                   lambda b, t: (b, 0, t)),
        ),
        compiler_params=pltpu.CompilerParams(
            dimension_semantics=("parallel", "parallel"),
            vmem_limit_bytes=48 * 1024 * 1024),
    )(g_flat, x_flat, wg2, wx2, tgx, wp2, tp)

    return out_flat.reshape(N, F_l, H, W)


# ----------------------------- pure-JAX reference -----------------------------
def attention_block_ref(g, x, params):
    (wg, bg, gg, beg, mg, vg,
     wx, bx, gx, bex, mx, vx,
     wp, bp, gp, bep, mp, vp) = params
    eps = 1e-5

    def conv_bn(inp, w, b, gamma, beta, mean, var):
        y = lax.conv_general_dilated(
            inp, w, window_strides=(1, 1), padding=((0, 0), (0, 0)),
            dimension_numbers=("NCHW", "OIHW", "NCHW"))
        y = y + b[None, :, None, None]
        y = (y - mean[None, :, None, None]) / jnp.sqrt(
            var[None, :, None, None] + eps)
        return y * gamma[None, :, None, None] + beta[None, :, None, None]

    g1 = conv_bn(g, wg, bg, gg, beg, mg, vg)
    x1 = conv_bn(x, wx, bx, gx, bex, mx, vx)
    psi = jnp.maximum(g1 + x1, 0.0)
    psi = conv_bn(psi, wp, bp, gp, bep, mp, vp)
    psi = jax.nn.sigmoid(psi)
    return x * psi


if __name__ == "__main__":
    # Small shapes consistent with the module: F_g = F_l = 8, F_int = 4.
    N, F_g, F_l, F_int, H, W = 2, 8, 8, 4, 16, 16

    key = jax.random.PRNGKey(0)
    ks = jax.random.split(key, 20)

    g_in = jax.random.normal(ks[0], (N, F_g, H, W), jnp.float32)
    x_in = jax.random.normal(ks[1], (N, F_l, H, W), jnp.float32)

    # W_g branch: conv (F_int, F_g, 1, 1) + bias, BN(F_int)
    wg = 0.2 * jax.random.normal(ks[2], (F_int, F_g, 1, 1), jnp.float32)
    bg = 0.1 * jax.random.normal(ks[3], (F_int,), jnp.float32)
    gg = 1.0 + 0.1 * jax.random.normal(ks[4], (F_int,), jnp.float32)
    beg = 0.1 * jax.random.normal(ks[5], (F_int,), jnp.float32)
    mg = 0.1 * jax.random.normal(ks[6], (F_int,), jnp.float32)
    vg = 1.0 + 0.1 * jnp.abs(jax.random.normal(ks[7], (F_int,), jnp.float32))

    # W_x branch: conv (F_int, F_l, 1, 1) + bias, BN(F_int)
    wx = 0.2 * jax.random.normal(ks[8], (F_int, F_l, 1, 1), jnp.float32)
    bx = 0.1 * jax.random.normal(ks[9], (F_int,), jnp.float32)
    gx = 1.0 + 0.1 * jax.random.normal(ks[10], (F_int,), jnp.float32)
    bex = 0.1 * jax.random.normal(ks[11], (F_int,), jnp.float32)
    mx = 0.1 * jax.random.normal(ks[12], (F_int,), jnp.float32)
    vx = 1.0 + 0.1 * jnp.abs(jax.random.normal(ks[13], (F_int,), jnp.float32))

    # psi branch: conv (1, F_int, 1, 1) + bias, BN(1)
    wp = 0.2 * jax.random.normal(ks[14], (1, F_int, 1, 1), jnp.float32)
    bp = 0.1 * jax.random.normal(ks[15], (1,), jnp.float32)
    gp = 1.0 + 0.1 * jax.random.normal(ks[16], (1,), jnp.float32)
    bep = 0.1 * jax.random.normal(ks[17], (1,), jnp.float32)
    mp = 0.1 * jax.random.normal(ks[18], (1,), jnp.float32)
    vp = 1.0 + 0.1 * jnp.abs(jax.random.normal(ks[19], (1,), jnp.float32))

    params = (wg, bg, gg, beg, mg, vg,
              wx, bx, gx, bex, mx, vx,
              wp, bp, gp, bep, mp, vp)

    ref = attention_block_ref(g_in, x_in, params)

    # Default tiling (whole HW fits in one lane tile here -> grid=(N, 1)).
    out = attention_block_pallas(g_in, x_in, params)
    out = jax.block_until_ready(out)
    assert out.shape == (N, F_l, H, W), out.shape
    # Tolerance allows for the EUP approx-reciprocal in the sigmoid.
    assert jnp.allclose(out, ref, atol=5e-3, rtol=1e-3), \
        float(jnp.max(jnp.abs(out - ref)))

    # Force the multi-tile HW path (T_hw=128 -> grid=(N, 2)) to exercise tiling.
    out_tiled = attention_block_pallas(g_in, x_in, params,
                                       vmem_block_budget_bytes=1)
    out_tiled = jax.block_until_ready(out_tiled)
    assert jnp.allclose(out_tiled, ref, atol=5e-3, rtol=1e-3), \
        float(jnp.max(jnp.abs(out_tiled - ref)))

    print("KERNEL_OK")
</pallas_src>

<mosaic_0001>
module attributes {stable_mosaic.version = 11 : i64} {
  func.func @_attention_block_kernel(%arg0: i32, %arg1: i32, %arg2: memref<1x8x256xf32, #tpu.memory_space<vmem>>, %arg3: memref<1x8x256xf32, #tpu.memory_space<vmem>>, %arg4: memref<4x8xf32, #tpu.memory_space<vmem>>, %arg5: memref<4x8xf32, #tpu.memory_space<vmem>>, %arg6: memref<4x1xf32, #tpu.memory_space<vmem>>, %arg7: memref<4x1xf32, #tpu.memory_space<vmem>>, %arg8: memref<1xf32, #tpu.memory_space<smem>>, %arg9: memref<1x8x256xf32, #tpu.memory_space<vmem>>) attributes {dimension_semantics = [#tpu.dimension_semantics<parallel>, #tpu.dimension_semantics<parallel>], iteration_bounds = array<i64: 2, 1>, scalar_prefetch = 0 : i64, scratch_operands = 0 : i64, tpu.core_type = #tpu.core_type<tc>, window_params = [{transform_indices = @transform_0, window_bounds = array<i64: 1, 8, 256>}, {transform_indices = @transform_1, window_bounds = array<i64: 1, 8, 256>}, {pipeline_mode = #tpu.pipeline_mode<synchronous>, transform_indices = @transform_2, window_bounds = array<i64: 4, 8>}, {pipeline_mode = #tpu.pipeline_mode<synchronous>, transform_indices = @transform_3, window_bounds = array<i64: 4, 8>}, {pipeline_mode = #tpu.pipeline_mode<synchronous>, transform_indices = @transform_4, window_bounds = array<i64: 4, 1>}, {pipeline_mode = #tpu.pipeline_mode<synchronous>, transform_indices = @transform_5, window_bounds = array<i64: 4, 1>}, {transform_indices = @transform_6, window_bounds = array<i64: 1>}, {transform_indices = @transform_7, window_bounds = array<i64: 1, 8, 256>}]} {
    %c0 = arith.constant 0 : index
    %c0_0 = arith.constant 0 : index
    %c0_1 = arith.constant 0 : index
    %0 = vector.load %arg2[%c0, %c0_0, %c0_1] : memref<1x8x256xf32, #tpu.memory_space<vmem>>, vector<1x8x256xf32>
    %1 = vector.shape_cast %0 : vector<1x8x256xf32> to vector<8x256xf32>
    %c0_2 = arith.constant 0 : index
    %c0_3 = arith.constant 0 : index
    %c0_4 = arith.constant 0 : index
    %2 = vector.load %arg3[%c0_2, %c0_3, %c0_4] : memref<1x8x256xf32, #tpu.memory_space<vmem>>, vector<1x8x256xf32>
    %3 = vector.shape_cast %2 : vector<1x8x256xf32> to vector<8x256xf32>
    %c0_5 = arith.constant 0 : index
    %c0_6 = arith.constant 0 : index
    %4 = vector.load %arg4[%c0_5, %c0_6] : memref<4x8xf32, #tpu.memory_space<vmem>>, vector<4x8xf32>
    %cst = arith.constant dense<0.000000e+00> : vector<4x256xf32>
    %5 = tpu.matmul %4, %1, %cst {dimension_numbers = #tpu.dot_dimension_numbers<[1], [0], [0], [1], [0, 0, 1, 1], [], []>} : vector<4x8xf32>, vector<8x256xf32>, vector<4x256xf32> -> vector<4x256xf32>
    %c0_7 = arith.constant 0 : index
    %c0_8 = arith.constant 0 : index
    %6 = vector.load %arg5[%c0_7, %c0_8] : memref<4x8xf32, #tpu.memory_space<vmem>>, vector<4x8xf32>
    %cst_9 = arith.constant dense<0.000000e+00> : vector<4x256xf32>
    %7 = tpu.matmul %6, %3, %cst_9 {dimension_numbers = #tpu.dot_dimension_numbers<[1], [0], [0], [1], [0, 0, 1, 1], [], []>} : vector<4x8xf32>, vector<8x256xf32>, vector<4x256xf32> -> vector<4x256xf32>
    %8 = arith.addf %5, %7 : vector<4x256xf32>
    %c0_10 = arith.constant 0 : index
    %c0_11 = arith.constant 0 : index
    %9 = vector.load %arg6[%c0_10, %c0_11] : memref<4x1xf32, #tpu.memory_space<vmem>>, vector<4x1xf32>
    %10 = vector.broadcast %9 : vector<4x1xf32> to vector<4x256xf32>
    %11 = arith.addf %8, %10 : vector<4x256xf32>
    %cst_12 = arith.constant 0.000000e+00 : f32
    %12 = vector.broadcast %cst_12 : f32 to vector<4x256xf32>
    %13 = arith.maximumf %11, %12 : vector<4x256xf32>
    %c0_13 = arith.constant 0 : index
    %c0_14 = arith.constant 0 : index
    %14 = vector.load %arg7[%c0_13, %c0_14] : memref<4x1xf32, #tpu.memory_space<vmem>>, vector<4x1xf32>
    %15 = vector.broadcast %14 : vector<4x1xf32> to vector<4x256xf32>
    %16 = arith.mulf %15, %13 : vector<4x256xf32>
    %cst_15 = arith.constant dense<0.000000e+00> : vector<256xf32>
    %17 = vector.multi_reduction <add>, %16, %cst_15 [0] : vector<4x256xf32> to vector<256xf32>
    %18 = vector.shape_cast %17 : vector<256xf32> to vector<1x256xf32>
    %c0_16 = arith.constant 0 : index
    %19 = memref.load %arg8[%c0_16] : memref<1xf32, #tpu.memory_space<smem>>
    %20 = vector.broadcast %19 : f32 to vector<1x256xf32>
    %21 = arith.addf %18, %20 : vector<1x256xf32>
    %cst_17 = arith.constant 0.000000e+00 : f32
    %22 = vector.broadcast %cst_17 : f32 to vector<1x256xf32>
    %23 = arith.subf %22, %21 : vector<1x256xf32>
    %24 = math.exp %23 : vector<1x256xf32>
    %cst_18 = arith.constant 1.000000e+00 : f32
    %25 = vector.broadcast %cst_18 : f32 to vector<1x256xf32>
    %26 = arith.addf %25, %24 : vector<1x256xf32>
    %27 = tpu.reciprocal %26 {approx = true} : vector<1x256xf32> -> vector<1x256xf32>
    %28 = vector.broadcast %27 : vector<1x256xf32> to vector<8x256xf32>
    %29 = arith.mulf %3, %28 : vector<8x256xf32>
    %c0_19 = arith.constant 0 : index
    %c0_20 = arith.constant 0 : index
    %c0_21 = arith.constant 0 : index
    %30 = vector.load %arg9[%c0_19, %c0_20, %c0_21] : memref<1x8x256xf32, #tpu.memory_space<vmem>>, vector<1x8x256xf32>
    %31 = vector.shape_cast %30 : vector<1x8x256xf32> to vector<8x256xf32>
    %32 = vector.shape_cast %29 : vector<8x256xf32> to vector<1x8x256xf32>
    tpu.vector_store %arg9[%c0_19, %c0_20, %c0_21], %32 {strides = array<i32>} : memref<1x8x256xf32, #tpu.memory_space<vmem>>, vector<1x8x256xf32>,
    return
  }
  func.func @transform_0(%arg0: i32, %arg1: i32) -> (i32, i32, i32) {
    %c0_i32 = arith.constant 0 : i32
    %c0_i32_0 = arith.constant 0 : i32
    return %arg0, %c0_i32, %arg1 : i32, i32, i32
  }
  func.func @transform_1(%arg0: i32, %arg1: i32) -> (i32, i32, i32) {
    %c0_i32 = arith.constant 0 : i32
    %c0_i32_0 = arith.constant 0 : i32
    return %arg0, %c0_i32, %arg1 : i32, i32, i32
  }
  func.func @transform_2(%arg0: i32, %arg1: i32) -> (i32, i32) {
    %c0_i32 = arith.constant 0 : i32
    %c0_i32_0 = arith.constant 0 : i32
    %c0_i32_1 = arith.constant 0 : i32
    return %c0_i32, %c0_i32_0 : i32, i32
  }
  func.func @transform_3(%arg0: i32, %arg1: i32) -> (i32, i32) {
    %c0_i32 = arith.constant 0 : i32
    %c0_i32_0 = arith.constant 0 : i32
    %c0_i32_1 = arith.constant 0 : i32
    return %c0_i32, %c0_i32_0 : i32, i32
  }
  func.func @transform_4(%arg0: i32, %arg1: i32) -> (i32, i32) {
    %c0_i32 = arith.constant 0 : i32
    %c0_i32_0 = arith.constant 0 : i32
    %c0_i32_1 = arith.constant 0 : i32
    return %c0_i32, %c0_i32_0 : i32, i32
  }
  func.func @transform_5(%arg0: i32, %arg1: i32) -> (i32, i32) {
    %c0_i32 = arith.constant 0 : i32
    %c0_i32_0 = arith.constant 0 : i32
    %c0_i32_1 = arith.constant 0 : i32
    return %c0_i32, %c0_i32_0 : i32, i32
  }
  func.func @transform_6(%arg0: i32, %arg1: i32) -> i32 {
    %c0_i32 = arith.constant 0 : i32
    %c0_i32_0 = arith.constant 0 : i32
    return %c0_i32 : i32
  }
  func.func @transform_7(%arg0: i32, %arg1: i32) -> (i32, i32, i32) {
    %c0_i32 = arith.constant 0 : i32
    %c0_i32_0 = arith.constant 0 : i32
    return %arg0, %c0_i32, %arg1 : i32, i32, i32
  }
}

</mosaic_0001>

<bundles_post_ra>
// kernel: tpu_custom_call.1
= control target key start
LH: loop header
LB: loop body
LE: loop exit
PB: predicated region body
PF: predicated region fallthrough
CT: control target
= control target key end

     0   :  { %s1237_s0 = inlined_call_operand.hbm [shape: f32[2,8,256], index: 0, kind: input, shape index: {}]   ;;  %s1238_s1 = inlined_call_operand.hbm [shape: f32[2,8,256], index: 1, kind: input, shape index: {}]   ;;  %s1239_s2 = inlined_call_operand.vmem [shape: f32[4,8], index: 2, kind: input, shape index: {}]   ;;  %s1240_s3 = inlined_call_operand.vmem [shape: f32[4,8], index: 3, kind: input, shape index: {}]   ;;  %s1241_s4 = inlined_call_operand.vmem [shape: f32[4,1], index: 4, kind: input, shape index: {}]   ;;  %s1242_s5 = inlined_call_operand.vmem [shape: f32[4,1], index: 5, kind: input, shape index: {}]   ;;  %s1243_s6 = inlined_call_operand.<no memory space> [shape: f32[1], index: 6, kind: input, shape index: {}]   ;;  %s1244_s7 = inlined_call_operand.hbm [shape: f32[2,8,256], index: 7, kind: output, shape index: {}]  }
   0x1   :  { %1248 = sst [smem:[#allocation12_spill]] %s1237_s0 }
   0x2   :  { %12 = sst [smem:[#allocation2]] %s1243_s6 }
   0x3   :  { %13 = vsyncpa [#allocation4], 0 }
   0x4   :  { %15 = vsyncpa [#allocation4 + $0x1], 0 }
   0x5   :  { %16 = vsyncpa [#allocation7], 0 }
   0x6   :  { %18 = vsyncpa [#allocation7 + $0x1], 0 }
   0x7   :  { %19 = vsyncpa [#allocation5], 0 }
   0x8   :  { %21 = vsyncpa [#allocation5 + $0x1], 0  ;;  %s992_s26 = smov 0   ;;  %s994_s27 = smov 0  }
   0x9   :  { %s996_s28 = smov 0   ;;  %s998_s29 = smov 0  }
   0xa   :  { %s1000_s30 = smov 0   ;;  %s1002_s8 = smov 0  }
   0xb LB: > { %s692_s6 = sadd.s32 4294967295, %s942_s8   ;;  %s693_s9 = sadd.s32 4294967294, %s942_s8   ;;  %s942_s8 = sphi %s1002_s8, %s27_s8   ;;  %s938_s30 = sphi %s1000_s30, %s1268_s30   ;;  %s934_s29 = sphi %s998_s29, %s1267_s29   ;;  %s930_s28 = sphi %s996_s28, %s1266_s28   ;;  %s926_s27 = sphi %s994_s27, %s1265_s27   ;;  %s922_s26 = sphi %s992_s26, %s1264_s26  }
   0xc   : > { %s39_s10 = sadd.s32 1, %s938_s30  ;;  %s48_s11 = sadd.s32 1, %s930_s28 }
   0xd   : > { %p41_p0 = scmp.ge.s32.totalorder %s39_s10, 2  ;;  %p55_p1 = scmp.ne.s32.totalorder %s930_s28, %s926_s27 }
   0xe   : > { %p56_p2 = scmp.eq.s32.totalorder %s942_s8, 0  ;;  %p61_p3 = scmp.ne.s32.totalorder %s926_s27, %s922_s26 }
   0xf   : > { %s1270_s10 = smov (%p41_p0, %s39_s10), 0  ;;  %p62_p5 = scmp.eq.s32.totalorder %s692_s6, 0 }
  0x10   : > { %p1033_p4 = por %p56_p2, %p55_p1  ;;  %s43_s13 = ssub.s32 %s938_s30, %s1270_s10 }
  0x11   : > { %p220_p6 = scmp.eq.s32.totalorder %s692_s6, 1  ;;  %p46_p7 = scmp.eq.s32.totalorder %s43_s13, 0 }
  0x12   : > { %p1039_p8 = por %p62_p5, %p61_p3  ;;  %p226_p10 = scmp.eq.s32.totalorder %s693_s9, 1 }
  0x13   : > { %p1043_p9 = por %p220_p6, %p55_p1  ;;  %p735_p13 = scmp.lt.s32.totalorder %s942_s8, 2 }
  0x14   : > { %s1250_s14 = scalar_select %p1039_p8, 1, 0 }
  0x15   : > { %s1251_s15 = scalar_select %p1043_p9, 1, 0 }
  0x16   : > { %s1048_s16 = scalar_select %p46_p7, %s930_s28, %s48_s11  }
  0x17   : > { %p1050_p11 = por %p226_p10, %p61_p3  ;;  %s1057_s18 = sand.u32 1, %s930_s28  }
  0x18   : > { %s1245_s19 = sshll.u32 %s1057_s18, 4  ;;  %s713_s20 = sshll.u32 %s938_s30, 8 }
  0x19   : > { %s1252_s17 = scalar_select %p1050_p11, 1, 0 }
  0x1a   : > { %s1253_s0 = sld [smem:[#allocation12_spill]]  ;;  %s265_s24 = scalar_lea.vmem [#allocation3], %s1245_s19 }
  0x1b   : > { %s275_s25 = sshll.u32 %s265_s24, 4  ;;  %p1074_p0 = pnand %p735_p13, %p1033_p4  ;;  %s1070_s25 = int_to_ptr.vmem [resolvable:$true] %s275_s25 }
  0x1c   : > { %s262_s9 = scalar_lea.sflag [#allocation4], %s1057_s18 }
  0x1d   : > { %p798_p5 = pneg %p1074_p0 }
  0x20   : > { %s1066_s23 = scalar_lea.hbm %s1253_s0, %s713_s20  ;;  %s801_s12 = scalar_lea.hbm %s1253_s0, 512 }
  0x21   : > { %s796_s11 = scalar_lea.hbm %s1066_s23, 256  ;;  %p802_p4 = scmp.lt.u32.totalorder %s1066_s23, %s1253_s0 }
  0x22   : > { %p797_p3 = scmp.ne.s32.totalorder %s1066_s23, %s796_s11  ;;  %p803_p10 = scmp.lt.u32.totalorder %s801_s12, %s796_s11 }
  0x23   : > { %p805_p12 = scmp.lt.u32.totalorder %s796_s11, %s1066_s23 }
  0x24   : > { %p799_p6 = pnand %p798_p5, %p797_p3  ;;  %p804_p13 = por %p803_p10, %p802_p4 }
  0x26   : > { %p800_p7 = pneg %p799_p6  ;;  %p806_p1 = por %p805_p12, %p804_p13 }
  0x28   : > { %p807_p2 = pnand %p806_p1, %p800_p7 }
  0x2a   : > { %810 = shalt.err (!%p807_p2)
}
  0x2b   : > { %s811_s19 = scalar_lea.vmem %s1070_s25, 256  ;;  %s944_s13 = smov [#allocation3]  }
  0x2c   : > { %p812_p3 = scmp.ne.s32.totalorder %s1070_s25, %s811_s19  ;;  %s816_s21 = sshll.u32 %s944_s13, 4  ;;  %s817_s21 = int_to_ptr.vmem [resolvable:$false] %s816_s21 }
  0x2d   : > { %s818_s22 = scalar_lea.vmem %s817_s21, 512  ;;  %p819_p9 = scmp.lt.s32.totalorder %s1070_s25, %s817_s21 }
  0x2e   : > { %p814_p6 = pnand %p812_p3, %p798_p5  ;;  %p820_p4 = scmp.lt.s32.totalorder %s818_s22, %s811_s19 }
  0x30   : > { %p815_p11 = pneg %p814_p6  ;;  %p821_p10 = por %p820_p4, %p819_p9 }
  0x32   : > { %p822_p12 = pnand %p821_p10, %p815_p11 }
  0x34   : > { %825 = shalt.err (!%p822_p12)
}
  0x35   : > { %727 = dma.hbm_to_vmem [thread:$0]  (!%p1074_p0), %s1066_s23, 256, %s1070_s25, %s262_s9  }
  0x36   : > { %p1255_p1 = scmp.lt.s32.totalorder %s942_s8, 3  ;;  %p1256_p2 = scmp.ge.s32.totalorder %s942_s8, 1 }
  0x37   : > { %s1119_s24 = scalar_lea.hbm %s1238_s1, %s713_s20  ;;  %s1258_s13 = sshll.u32 %s1057_s18, 4 }
  0x38   : > { %p1110_p7 = pnand %p1256_p2, %p1255_p1  ;;  %s286_s21 = scalar_lea.vmem [#allocation6], %s1258_s13 }
  0x39   : > { %s296_s22 = sshll.u32 %s286_s21, 4  ;;  %s283_s23 = scalar_lea.sflag [#allocation7], %s1057_s18  ;;  %s297_s22 = int_to_ptr.vmem [resolvable:$true] %s296_s22 }
  0x3a   : > { %s1257_s11 = scalar_select %p1110_p7, 1, 0 }
  0x3b   : > { %s826_s25 = scalar_lea.hbm %s1119_s24, 256  ;;  %s831_s20 = scalar_lea.hbm %s1238_s1, 512 }
  0x3c   : > { %p827_p9 = scmp.ne.s32.totalorder %s1119_s24, %s826_s25  ;;  %p832_p3 = scmp.lt.u32.totalorder %s1119_s24, %s1238_s1 }
  0x3d   : > { %p833_p6 = scmp.lt.u32.totalorder %s831_s20, %s826_s25  ;;  %p835_p10 = scmp.lt.u32.totalorder %s826_s25, %s1119_s24 }
  0x3e   : > { %p829_p11 = pnand %p827_p9, %p798_p5 }
  0x3f   : > { %p834_p4 = por %p833_p6, %p832_p3 }
  0x40   : > { %p830_p13 = pneg %p829_p11 }
  0x41   : > { %p836_p12 = por %p835_p10, %p834_p4 }
  0x43   : > { %p837_p1 = pnand %p836_p12, %p830_p13 }
  0x45   : > { %840 = shalt.err (!%p837_p1)
}
  0x46   : > { %s841_s18 = scalar_lea.vmem %s297_s22, 256  ;;  %s945_s13 = smov [#allocation6]  }
  0x47   : > { %p842_p2 = scmp.ne.s32.totalorder %s297_s22, %s841_s18  ;;  %s846_s0 = sshll.u32 %s945_s13, 4  ;;  %s847_s0 = int_to_ptr.vmem [resolvable:$false] %s846_s0 }
  0x48   : > { %s848_s21 = scalar_lea.vmem %s847_s0, 512  ;;  %p849_p8 = scmp.lt.s32.totalorder %s297_s22, %s847_s0 }
  0x49   : > { %p844_p9 = pnand %p842_p2, %p798_p5  ;;  %p850_p7 = scmp.lt.s32.totalorder %s848_s21, %s841_s18 }
  0x4b   : > { %p845_p11 = pneg %p844_p9  ;;  %p851_p3 = por %p850_p7, %p849_p8 }
  0x4d   : > { %p852_p6 = pnand %p851_p3, %p845_p11 }
  0x4f   : > { %855 = shalt.err (!%p852_p6)
}
  0x50   : > { %730 = dma.hbm_to_vmem [thread:$0]  (!%p1074_p0), %s1119_s24, 256, %s297_s22, %s283_s23  }
  0x51   : > { %p1259_p13 = scmp.ne.s32.totalorder %s1257_s11, 0 }
  0x52   : > { %s1146_s25 = sand.u32 (!%p1259_p13), 1, %s926_s27   ;;  %p1260_p8 = scmp.ne.s32.totalorder (!%p1259_p13), %s1250_s14, 0 }
  0x53   : > { %305 = sbr.rel (%p1259_p13) target bundleno = 378 (0x17a), region = 48  ;;  %s1149_s9 = sshll.u32 (!%p1259_p13), %s1146_s25, 4 }
  0x54   : > { %s308_s20 = scalar_lea.sflag (!%p1259_p13), [#allocation4], %s1146_s25  ;;  %s311_s19 = scalar_lea.vmem (!%p1259_p13), [#allocation3], %s1149_s9 }
  0x5a   : > { %909 = dma.done.wait (%p1260_p8), %s308_s20, 256  }
  0x5b   : > { %911 = vsyncadd (%p1260_p8), %s308_s20, 4294967040  ;;  %s317_s6 = scalar_lea.sflag [#allocation7], %s1146_s25  ;;  %s320_s11 = scalar_lea.vmem [#allocation6], %s1149_s9 }
  0x5c   : > { %913 = dma.done.wait (%p1260_p8), %s317_s6, 256  }
  0x5d   : > { %915 = vsyncadd (%p1260_p8), %s317_s6, 4294967040  ;;  %v946_v0 = vmov 0.0   ;;  %v947_v1 = vmov 0   ;;  %v1163_v2 = vld [vmem:[%s320_s11 + $0x8] sm:$0xff]  ;;  %v1165_v4 = vld [vmem:[%s320_s11] sm:$0xff]  ;;  %vm365_vm0 = vcmask 64512  }
  0x5e   : > { %433 = vmatprep.mubr.f32.mxu1 %v946_v0  ;;  %507 = vmatprep.mubr.f32.mxu0 %v946_v0  ;;  %v360_v3 = vld [vmem:[%s311_s19 + $0x8] sm:$0xff]  ;;  %v359_v5 = vld [vmem:[%s311_s19] sm:$0xff]  ;;  %vm532_vm1 = vcmask 1043456   ;;  %s547_s21 = sld [smem:[#allocation2]]  ;;  %s715_s20 = sshll.u32 %s934_s29, 8 }
  0x5f   : > { %787 = vset.pattern.permute.xlu0 %v947_v1  ;;  %369 = vmatprep.subr.mxu1 %v1163_v2  ;;  %v364_v6 = vld [vmem:[%s1240_s3] sm:$0xf]  ;;  %s355_s19 = scalar_lea.vmem [#allocation8], %s1149_s9  ;;  %s1188_s22 = scalar_lea.hbm %s1244_s7, %s715_s20 }
  0x60   : > { %443 = vmatprep.subr.mxu0 %v360_v3  ;;  %v363_v7 = vld [vmem:[%s1239_s2] sm:$0xf]  ;;  %370 = vmatpush1.msra.mxu1 %v1165_v4  ;;  %s582_s6 = sshll.u32 %s355_s19, 4  ;;  %s566_s29 = scalar_lea.sflag [#allocation5], %s1146_s25  ;;  %s1190_s6 = int_to_ptr.vmem [resolvable:$true] %s582_s6 }
  0x61   : > { %444 = vmatpush1.msra.mxu0 %v359_v5  ;;  %v514_v8 = vld [vmem:[%s1241_s4] sm:$0xf]  ;;  %706 = vmatmul.mubr.msk.f32.vlgmr.msra.gmra.mrb[0].mxu1 %vm365_vm0, %v364_v6  ;;  %s856_s9 = scalar_lea.vmem %s1190_s6, 256  ;;  %p1261_p5 = scmp.ne.s32.totalorder %s1251_s15, 0 }
  0x62   : > { %707 = vmatmul.mubr.msk.f32.vlgmr.msra.gmra.mrb[0].mxu0 %vm365_vm0, %v363_v7  ;;  %517 = vperm.xlu0 %787, %v514_v8   ;;  %v524_v9 = vld [vmem:[%s1242_s5] sm:$0xf]  ;;  %p857_p0 = scmp.ne.s32.totalorder %s1190_s6, %s856_s9  ;;  %s948_s14 = smov [#allocation8]  }
  0x63   : > { %s860_s23 = sshll.u32 %s948_s14, 4  ;;  %s861_s23 = int_to_ptr.vmem [resolvable:$false] %s860_s23 }
  0x64   : > { %v548_v35 = vstv %s547_s21  ;;  %p858_p7 = pnand %p857_p0, %p1261_p5  ;;  %s862_s12 = scalar_lea.vmem %s861_s23, 512 }
  0x65   : > { %p863_p10 = scmp.lt.s32.totalorder %s1190_s6, %s861_s23  ;;  %p864_p12 = scmp.lt.s32.totalorder %s862_s12, %s856_s9 }
  0x66   : > { %527 = vperm.xlu0 %787, %v524_v9   ;;  %p859_p4 = pneg %p858_p7 }
  0x67   : > { %p865_p1 = por %p864_p12, %p863_p10 }
  0x69   : > { %p866_p2 = pnand %p865_p1, %p859_p4 }
  0xe1   : > { %v518_v10 = vpop.permute.xlu0 %517 }
  0xe5   : > { %v528_v20 = vpop.permute.xlu0 %527 }
 0x134   : > { %v435_v11 = vpop.f32.mrb[0].mxu1 }
 0x135   : > { %v509_v12 = vpop.f32.mrb[0].mxu0  ;;  %v437_v14 = vpop.f32.mrb[1].mxu1 }
 0x136   : > { %v510_v13 = vadd.f32 %v509_v12, %v435_v11  ;;  %v511_v15 = vpop.f32.mrb[1].mxu0 }
 0x137   : > { %v512_v16 = vadd.f32 %v511_v15, %v437_v14 }
 0x138   : > { %v520_v17 = vadd.f32 %v518_v10, %v510_v13 }
 0x139   : > { %v521_v18 = vadd.f32 %v518_v10, %v512_v16 }
 0x13a   : > { %v522_v19 = vmax.f32 %v520_v17, 0.0 }
 0x13b   : > { %v523_v21 = vmax.f32 %v521_v18, 0.0 }
 0x13c   : > { %v530_v22 = vmul.f32 %v528_v20, %v522_v19 }
 0x13d   : > { %v531_v23 = vmul.f32 %v528_v20, %v523_v21 }
 0x13e   : > { %v533_v24 = vsel %vm532_vm1, %v530_v22, 0.0 }
 0x13f   : > { %v534_v25 = vrot.slane %v533_v24, 4  ;;  %v540_v26 = vsel %vm532_vm1, %v531_v23, 0.0 }
 0x140   : > { %v541_v27 = vrot.slane %v540_v26, 4 }
 0x141   : > { %v535_v28 = vadd.f32 %v534_v25, %v533_v24 }
 0x142   : > { %v542_v29 = vadd.f32 %v541_v27, %v540_v26 }
 0x143   : > { %v536_v30 = vrot.slane %v535_v28, 2 }
 0x144   : > { %v543_v31 = vrot.slane %v542_v29, 2 }
 0x145   : > { %v537_v32 = vadd.f32 %v536_v30, %v535_v28 }
 0x146   : > { %v544_v33 = vadd.f32 %v543_v31, %v542_v29 }
 0x147   : > { %v538_v34 = vrot.slane %v537_v32, 1 }
 0x148   : > { %v545_v36 = vrot.slane %v544_v33, 1 }
 0x149   : > { %v539_v37 = vadd.f32 %v538_v34, %v537_v32 }
 0x14a   : > { %v546_v38 = vadd.f32 %v545_v36, %v544_v33 }
 0x14b   : > { %v549_v39 = vadd.f32 %v548_v35, %v539_v37 }
 0x14c   : > { %v550_v40 = vadd.f32 %v548_v35, %v546_v38 }
 0x14d   : > { %v551_v41 = vsub.f32 0.0, %v549_v39 }
 0x14e   : > { %v552_v42 = vsub.f32 0.0, %v550_v40 }
 0x14f   : > { %v553_v43 = vmul.f32 1.442695, %v551_v41 }
 0x150   : > { %v555_v44 = vmul.f32 1.442695, %v552_v42 }
 0x151   : > { %788 = vpow2.f32 %v553_v43 }
 0x152   : > { %790 = vpow2.f32 %v555_v44 }
 0x15b   : > { %v789_v45 = vpop.eup %788 }
 0x15c   : > { %v791_v46 = vpop.eup %790  ;;  %v557_v47 = vadd.f32 1.0, %v789_v45 }
 0x15d   : > { %v558_v48 = vadd.f32 1.0, %v791_v46 }
 0x15e   : > { %792 = vrcp.f32 %v557_v47 }
 0x15f   : > { %794 = vrcp.f32 %v558_v48 }
 0x168   : > { %v793_v49 = vpop.eup %792 }
 0x169   : > { %v795_v50 = vpop.eup %794  ;;  %v561_v51 = vmul.f32 %v793_v49, %v1165_v4 }
 0x16a   : > { %v562_v52 = vmul.f32 %v795_v50, %v1163_v2 }
 0x16b   : > { %563 = vst [vmem:[%s355_s19] sm:$0xff] %v561_v51 }
 0x16c   : > { %564 = vst [vmem:[%s355_s19 + $0x8] sm:$0xff] %v562_v52 }
 0x16d   : > { %869 = shalt.err (!%p866_p2)
}
 0x16e   : > { %s870_s25 = scalar_lea.hbm %s1188_s22, 256  ;;  %s874_s0 = scalar_lea.hbm %s1244_s7, 512 }
 0x16f   : > { %p871_p9 = scmp.ne.s32.totalorder %s1188_s22, %s870_s25  ;;  %p875_p6 = scmp.lt.u32.totalorder %s1188_s22, %s1244_s7 }
 0x170   : > { %p876_p13 = scmp.lt.u32.totalorder %s874_s0, %s870_s25  ;;  %p878_p0 = scmp.lt.u32.totalorder %s870_s25, %s1188_s22 }
 0x171   : > { %p872_p11 = pnand %p871_p9, %p1261_p5 }
 0x172   : > { %p877_p8 = por %p876_p13, %p875_p6 }
 0x173   : > { %p873_p3 = pneg %p872_p11 }
 0x174   : > { %p879_p7 = por %p878_p0, %p877_p8 }
 0x176   : > { %p880_p4 = pnand %p879_p7, %p873_p3 }
 0x178   : > { %883 = shalt.err (!%p880_p4)
}
 0x179   : > { %722 = dma.vmem_to_hbm [thread:$0]  (%p1261_p5), %s1190_s6, 256, %s1188_s22, %s566_s29  }
 0x17a PF: > { %s594_s19 = sand.u32 1, %s922_s26   ;;  %p1262_p10 = scmp.ne.s32.totalorder %s1252_s17, 0 }
 0x17b   : > { %p1263_p12 = scmp.ge.s32.totalorder %s942_s8, 2  ;;  %s595_s11 = scalar_lea.sflag [#allocation5], %s594_s19 }
 0x17d   : > { %p732_p1 = pnand %p1263_p12, %p1262_p10 }
 0x17f   : > { %917 = dma.done.wait (!%p732_p1), %s595_s11, 256  }
 0x180   : > { %919 = vsyncadd (!%p732_p1), %s595_s11, 4294967040  ;;  %s27_s8 = sadd.s32 1, %s942_s8   ;;  %s1264_s26 = smov %s926_s27 }
 0x181   : > { %p24_p2 = scmp.ge.s32.totalorder %s27_s8, 4   ;;  %s1265_s27 = smov %s930_s28 }
 0x182   : > { %s1266_s28 = smov %s1048_s16  ;;  %s1267_s29 = smov %s938_s30 }
 0x183   : > { %s1268_s30 = smov %s1270_s10  ;;  %26 = sbr.rel (!%p24_p2) target bundleno = 11 (0xb), region = 106 }
 0x18a   :  { %600 = vsyncpa [#allocation4], 1 }
 0x18b   :  { %602 = vsyncpa [#allocation4 + $0x1], 1 }
 0x18c   :  { %603 = vsyncpa [#allocation7], 1 }
 0x18d   :  { %605 = vsyncpa [#allocation7 + $0x1], 1 }
 0x18e   :  { %606 = vsyncpa [#allocation5], 1 }
 0x18f   :  { %608 = vsyncpa [#allocation5 + $0x1], 1 }

</bundles_post_ra>
